<compile_context>
chip_gen: v5e
topology: v5e:2x2
jax: 0.10.0
libtpu: 0.0.40
codegen_flags: <defaults>
</compile_context>

<pallas_src>
import functools

import jax
import jax.numpy as jnp
from jax.experimental import pallas as pl
from jax.experimental.pallas import tpu as pltpu


def _round_up(x, m):
    return (x + m - 1) // m * m


# ------------------------------ kernels --------------------------------------

def _se_pool_mlp_kernel(x_ref, w1_ref, b1_ref, w2_ref, b2_ref,
                        gate_ref, acc_ref, *, inv_s):
    """Fused global-avg-pool + squeeze/excite MLP + hard-sigmoid gate.

    x_ref:    (1, C, ts)    spatial tile of one batch element
    w1_ref:   (C, C_sq)     squeeze 1x1-conv weight (as matrix)
    b1_ref:   (1, C_sq)
    w2_ref:   (C_sq, C)     excite 1x1-conv weight (as matrix)
    b2_ref:   (1, C)
    gate_ref: (1, C, 1)     output gate for this batch element
    acc_ref:  (1, C, 1)     VMEM accumulator (per-channel running sum)
    """
    s = pl.program_id(1)

    @pl.when(s == 0)
    def _():
        acc_ref[...] = jnp.zeros_like(acc_ref)

    # Per-channel partial sum of this tile (lane reduce -> XLU, f32 accum).
    acc_ref[...] += jnp.sum(x_ref[...].astype(jnp.float32), axis=-1,
                            keepdims=True)

    @pl.when(s == pl.num_programs(1) - 1)
    def _():
        pooled = acc_ref[...] * inv_s                         # (1, C, 1) mean
        # squeeze 1x1 conv (+bias) + ReLU — tiny contraction on the VPU.
        h = jnp.sum(pooled * w1_ref[...][None, :, :], axis=1)  # (1, C_sq)
        h = jnp.maximum(h + b1_ref[...], 0.0)
        # excite 1x1 conv (+bias)
        e = jnp.sum(h[:, :, None] * w2_ref[...][None, :, :], axis=1)  # (1, C)
        e = e + b2_ref[...]
        # hard sigmoid: relu6(e + 3) / 6
        gate = jnp.clip(e + 3.0, 0.0, 6.0) * (1.0 / 6.0)
        gate_ref[...] = gate[:, :, None].astype(gate_ref.dtype)


def _se_scale_kernel(x_ref, gate_ref, o_ref):
    """out = x * gate[n, c]; gate broadcast along the lane (spatial) axis."""
    o_ref[...] = (x_ref[...] * gate_ref[...]).astype(o_ref.dtype)


# ------------------------------ wrapper ---------------------------------------

def squeeze_excite_forward(x, w_sq, b_sq, w_ex, b_ex):
    """SqueezeExcite forward.

    x:    (N, C, H, W)       NCHW activations (PyTorch layout)
    w_sq: (C_sq, C, 1, 1)    squeeze_conv weight,  b_sq: (C_sq,)
    w_ex: (C, C_sq, 1, 1)    excite_conv weight,   b_ex: (C,)
    """
    N, C, H, W = x.shape
    C_sq = w_sq.shape[0]
    S = H * W

    # Contiguous (free) reshape: spatial goes to the lane axis.
    xf = x.reshape(N, C, S)

    # Lane-dense spatial tile: multiple of 128, block bytes capped (~2 MiB) so
    # double-buffered tiles stay far under v7x's scoped-VMEM default.
    s128 = _round_up(S, 128)
    max_ts = max(128, ((1 << 21) // max(1, C * 4)) // 128 * 128)
    ts = min(s128, max_ts, 2048)
    S_pad = _round_up(S, ts)
    if S_pad != S:
        # zero padding is sum-safe for the pooling pass; padded cols are
        # sliced off after the scale pass.
        xf = jnp.pad(xf, ((0, 0), (0, 0), (0, S_pad - S)))
    n_s = S_pad // ts

    # 1x1-conv weights as (in, out) matrices, biases as (1, out) rows.
    w1 = w_sq.reshape(C_sq, C).T.astype(jnp.float32)          # (C, C_sq)
    b1 = b_sq.reshape(1, C_sq).astype(jnp.float32)
    w2 = w_ex.reshape(C, C_sq).T.astype(jnp.float32)          # (C_sq, C)
    b2 = b_ex.reshape(1, C).astype(jnp.float32)

    # ---- pass 1: fused pool + MLP + h-sigmoid -> per-(n, c) gate -----------
    gate = pl.pallas_call(
        functools.partial(_se_pool_mlp_kernel, inv_s=1.0 / float(S)),
        out_shape=jax.ShapeDtypeStruct((N, C, 1), jnp.float32),
        grid_spec=pltpu.PrefetchScalarGridSpec(
            num_scalar_prefetch=0,
            grid=(N, n_s),                       # reduction axis last
            in_specs=[
                pl.BlockSpec((1, C, ts), lambda n, s: (n, 0, s)),
                pl.BlockSpec((C, C_sq), lambda n, s: (0, 0)),
                pl.BlockSpec((1, C_sq), lambda n, s: (0, 0)),
                pl.BlockSpec((C_sq, C), lambda n, s: (0, 0)),
                pl.BlockSpec((1, C), lambda n, s: (0, 0)),
            ],
            out_specs=pl.BlockSpec((1, C, 1), lambda n, s: (n, 0, 0)),
            scratch_shapes=[pltpu.VMEM((1, C, 1), jnp.float32)],
        ),
        compiler_params=pltpu.CompilerParams(
            dimension_semantics=("parallel", "arbitrary")),
    )(xf, w1, b1, w2, b2)

    # ---- pass 2: out = x * gate (row-tiled, fully parallel) ----------------
    out = pl.pallas_call(
        _se_scale_kernel,
        out_shape=jax.ShapeDtypeStruct((N, C, S_pad), x.dtype),
        grid_spec=pltpu.PrefetchScalarGridSpec(
            num_scalar_prefetch=0,
            grid=(N, n_s),
            in_specs=[
                pl.BlockSpec((1, C, ts), lambda n, s: (n, 0, s)),
                pl.BlockSpec((1, C, 1), lambda n, s: (n, 0, 0)),
            ],
            out_specs=pl.BlockSpec((1, C, ts), lambda n, s: (n, 0, s)),
        ),
        compiler_params=pltpu.CompilerParams(
            dimension_semantics=("parallel", "parallel")),
    )(xf, gate)

    if S_pad != S:
        out = out[:, :, :S]
    return out.reshape(N, C, H, W)


# ------------------------------ demo / check ----------------------------------

if __name__ == "__main__":
    # Small shapes consistent with SqueezeExcite(C_in=4, C_squeeze=2).
    N, C_in, H, W = 2, 4, 16, 16
    C_sq = 2

    key = jax.random.PRNGKey(0)
    kx, k1, k2, k3, k4 = jax.random.split(key, 5)
    x = jax.random.normal(kx, (N, C_in, H, W), dtype=jnp.float32)
    w_sq = jax.random.normal(k1, (C_sq, C_in, 1, 1), dtype=jnp.float32) * 0.5
    b_sq = jax.random.normal(k2, (C_sq,), dtype=jnp.float32) * 0.1
    w_ex = jax.random.normal(k3, (C_in, C_sq, 1, 1), dtype=jnp.float32) * 0.5
    b_ex = jax.random.normal(k4, (C_in,), dtype=jnp.float32) * 0.1

    out = squeeze_excite_forward(x, w_sq, b_sq, w_ex, b_ex)
    out = jax.block_until_ready(out)

    # Reference: plain JAX mirror of the PyTorch module.
    pooled = x.mean(axis=(2, 3))                                      # (N, C)
    h = jnp.maximum(pooled @ w_sq.reshape(C_sq, C_in).T + b_sq, 0.0)  # (N, C_sq)
    e = h @ w_ex.reshape(C_in, C_sq).T + b_ex                         # (N, C)
    gate_ref = jnp.clip(e + 3.0, 0.0, 6.0) / 6.0
    ref = x * gate_ref[:, :, None, None]

    assert out.shape == ref.shape, (out.shape, ref.shape)
    err = float(jnp.max(jnp.abs(out - ref)))
    assert err < 1e-4, err
    print("KERNEL_OK")
</pallas_src>

<mosaic_0001>
module attributes {stable_mosaic.version = 11 : i64} {
  func.func @_se_pool_mlp_kernel(%arg0: i32, %arg1: i32, %arg2: memref<1x4x256xf32, #tpu.memory_space<vmem>>, %arg3: memref<4x2xf32, #tpu.memory_space<vmem>>, %arg4: memref<1x2xf32, #tpu.memory_space<vmem>>, %arg5: memref<2x4xf32, #tpu.memory_space<vmem>>, %arg6: memref<1x4xf32, #tpu.memory_space<vmem>>, %arg7: memref<1x4x1xf32, #tpu.memory_space<vmem>>, %arg8: memref<1x4x1xf32, #tpu.memory_space<vmem>>) attributes {dimension_semantics = [#tpu.dimension_semantics<parallel>, #tpu.dimension_semantics<arbitrary>], iteration_bounds = array<i64: 2, 1>, scalar_prefetch = 0 : i64, scratch_operands = 1 : i64, tpu.core_type = #tpu.core_type<tc>, window_params = [{transform_indices = @transform_0, window_bounds = array<i64: 1, 4, 256>}, {pipeline_mode = #tpu.pipeline_mode<synchronous>, transform_indices = @transform_1, window_bounds = array<i64: 4, 2>}, {pipeline_mode = #tpu.pipeline_mode<synchronous>, transform_indices = @transform_2, window_bounds = array<i64: 1, 2>}, {pipeline_mode = #tpu.pipeline_mode<synchronous>, transform_indices = @transform_3, window_bounds = array<i64: 2, 4>}, {pipeline_mode = #tpu.pipeline_mode<synchronous>, transform_indices = @transform_4, window_bounds = array<i64: 1, 4>}, {transform_indices = @transform_5, window_bounds = array<i64: 1, 4, 1>}]} {
    %c0_i32 = arith.constant 0 : i32
    %0 = arith.cmpi eq, %arg1, %c0_i32 : i32
    %1 = arith.extui %0 : i1 to i32
    %c0_i32_0 = arith.constant 0 : i32
    %2 = arith.cmpi ne, %1, %c0_i32_0 : i32
    scf.if %2 {
      %cst_11 = arith.constant 0.000000e+00 : f32
      %12 = vector.broadcast %cst_11 : f32 to vector<1x4x1xf32>
      %c0_12 = arith.constant 0 : index
      %c0_13 = arith.constant 0 : index
      %c0_14 = arith.constant 0 : index
      %13 = vector.load %arg8[%c0_12, %c0_13, %c0_14] : memref<1x4x1xf32, #tpu.memory_space<vmem>>, vector<1x4x1xf32>
      tpu.vector_store %arg8[%c0_12, %c0_13, %c0_14], %12 {strides = array<i32>} : memref<1x4x1xf32, #tpu.memory_space<vmem>>, vector<1x4x1xf32>,
    } else {
    }
    %c0 = arith.constant 0 : index
    %c0_1 = arith.constant 0 : index
    %c0_2 = arith.constant 0 : index
    %3 = vector.load %arg8[%c0, %c0_1, %c0_2] : memref<1x4x1xf32, #tpu.memory_space<vmem>>, vector<1x4x1xf32>
    %c0_3 = arith.constant 0 : index
    %c0_4 = arith.constant 0 : index
    %c0_5 = arith.constant 0 : index
    %4 = vector.load %arg2[%c0_3, %c0_4, %c0_5] : memref<1x4x256xf32, #tpu.memory_space<vmem>>, vector<1x4x256xf32>
    %cst = arith.constant dense<0.000000e+00> : vector<1x4xf32>
    %5 = vector.multi_reduction <add>, %4, %cst [2] : vector<1x4x256xf32> to vector<1x4xf32>
    %6 = vector.shape_cast %5 : vector<1x4xf32> to vector<1x4x1xf32>
    %7 = arith.addf %3, %6 : vector<1x4x1xf32>
    %c0_6 = arith.constant 0 : index
    %c0_7 = arith.constant 0 : index
    %c0_8 = arith.constant 0 : index
    %8 = vector.load %arg8[%c0_6, %c0_7, %c0_8] : memref<1x4x1xf32, #tpu.memory_space<vmem>>, vector<1x4x1xf32>
    tpu.vector_store %arg8[%c0_6, %c0_7, %c0_8], %7 {strides = array<i32>} : memref<1x4x1xf32, #tpu.memory_space<vmem>>, vector<1x4x1xf32>,
    %c0_i32_9 = arith.constant 0 : i32
    %9 = arith.cmpi eq, %arg1, %c0_i32_9 : i32
    %10 = arith.extui %9 : i1 to i32
    %c0_i32_10 = arith.constant 0 : i32
    %11 = arith.cmpi ne, %10, %c0_i32_10 : i32
    scf.if %11 {
      %c0_11 = arith.constant 0 : index
      %c0_12 = arith.constant 0 : index
      %c0_13 = arith.constant 0 : index
      %12 = vector.load %arg8[%c0_11, %c0_12, %c0_13] : memref<1x4x1xf32, #tpu.memory_space<vmem>>, vector<1x4x1xf32>
      %cst_14 = arith.constant 3.906250e-03 : f32
      %13 = vector.broadcast %cst_14 : f32 to vector<1x4x1xf32>
      %14 = arith.mulf %12, %13 : vector<1x4x1xf32>
      %c0_15 = arith.constant 0 : index
      %c0_16 = arith.constant 0 : index
      %15 = vector.load %arg3[%c0_15, %c0_16] : memref<4x2xf32, #tpu.memory_space<vmem>>, vector<4x2xf32>
      %16 = vector.shape_cast %15 : vector<4x2xf32> to vector<1x4x2xf32>
      %17 = vector.broadcast %14 : vector<1x4x1xf32> to vector<1x4x2xf32>
      %18 = arith.mulf %17, %16 : vector<1x4x2xf32>
      %cst_17 = arith.constant dense<0.000000e+00> : vector<1x2xf32>
      %19 = vector.multi_reduction <add>, %18, %cst_17 [1] : vector<1x4x2xf32> to vector<1x2xf32>
      %c0_18 = arith.constant 0 : index
      %c0_19 = arith.constant 0 : index
      %20 = vector.load %arg4[%c0_18, %c0_19] : memref<1x2xf32, #tpu.memory_space<vmem>>, vector<1x2xf32>
      %21 = arith.addf %19, %20 : vector<1x2xf32>
      %cst_20 = arith.constant 0.000000e+00 : f32
      %22 = vector.broadcast %cst_20 : f32 to vector<1x2xf32>
      %23 = arith.maximumf %21, %22 : vector<1x2xf32>
      %24 = vector.shape_cast %23 : vector<1x2xf32> to vector<1x2x1xf32>
      %c0_21 = arith.constant 0 : index
      %c0_22 = arith.constant 0 : index
      %25 = vector.load %arg5[%c0_21, %c0_22] : memref<2x4xf32, #tpu.memory_space<vmem>>, vector<2x4xf32>
      %26 = vector.shape_cast %25 : vector<2x4xf32> to vector<1x2x4xf32>
      %27 = vector.broadcast %24 : vector<1x2x1xf32> to vector<1x2x4xf32>
      %28 = arith.mulf %27, %26 : vector<1x2x4xf32>
      %cst_23 = arith.constant dense<0.000000e+00> : vector<1x4xf32>
      %29 = vector.multi_reduction <add>, %28, %cst_23 [1] : vector<1x2x4xf32> to vector<1x4xf32>
      %c0_24 = arith.constant 0 : index
      %c0_25 = arith.constant 0 : index
      %30 = vector.load %arg6[%c0_24, %c0_25] : memref<1x4xf32, #tpu.memory_space<vmem>>, vector<1x4xf32>
      %31 = arith.addf %29, %30 : vector<1x4xf32>
      %cst_26 = arith.constant 3.000000e+00 : f32
      %32 = vector.broadcast %cst_26 : f32 to vector<1x4xf32>
      %33 = arith.addf %31, %32 : vector<1x4xf32>
      %cst_27 = arith.constant 0.000000e+00 : f32
      %cst_28 = arith.constant 6.000000e+00 : f32
      %34 = vector.broadcast %cst_27 : f32 to vector<1x4xf32>
      %35 = arith.maximumf %34, %33 : vector<1x4xf32>
      %36 = vector.broadcast %cst_28 : f32 to vector<1x4xf32>
      %37 = arith.minimumf %36, %35 : vector<1x4xf32>
      %cst_29 = arith.constant 0.166666672 : f32
      %38 = vector.broadcast %cst_29 : f32 to vector<1x4xf32>
      %39 = arith.mulf %37, %38 : vector<1x4xf32>
      %40 = vector.shape_cast %39 : vector<1x4xf32> to vector<1x4x1xf32>
      %c0_30 = arith.constant 0 : index
      %c0_31 = arith.constant 0 : index
      %c0_32 = arith.constant 0 : index
      %41 = vector.load %arg7[%c0_30, %c0_31, %c0_32] : memref<1x4x1xf32, #tpu.memory_space<vmem>>, vector<1x4x1xf32>
      tpu.vector_store %arg7[%c0_30, %c0_31, %c0_32], %40 {strides = array<i32>} : memref<1x4x1xf32, #tpu.memory_space<vmem>>, vector<1x4x1xf32>,
    } else {
    }
    return
  }
  func.func @transform_0(%arg0: i32, %arg1: i32) -> (i32, i32, i32) {
    %c0_i32 = arith.constant 0 : i32
    %c0_i32_0 = arith.constant 0 : i32
    return %arg0, %c0_i32, %arg1 : i32, i32, i32
  }
  func.func @transform_1(%arg0: i32, %arg1: i32) -> (i32, i32) {
    %c0_i32 = arith.constant 0 : i32
    %c0_i32_0 = arith.constant 0 : i32
    %c0_i32_1 = arith.constant 0 : i32
    return %c0_i32, %c0_i32_0 : i32, i32
  }
  func.func @transform_2(%arg0: i32, %arg1: i32) -> (i32, i32) {
    %c0_i32 = arith.constant 0 : i32
    %c0_i32_0 = arith.constant 0 : i32
    %c0_i32_1 = arith.constant 0 : i32
    return %c0_i32, %c0_i32_0 : i32, i32
  }
  func.func @transform_3(%arg0: i32, %arg1: i32) -> (i32, i32) {
    %c0_i32 = arith.constant 0 : i32
    %c0_i32_0 = arith.constant 0 : i32
    %c0_i32_1 = arith.constant 0 : i32
    return %c0_i32, %c0_i32_0 : i32, i32
  }
  func.func @transform_4(%arg0: i32, %arg1: i32) -> (i32, i32) {
    %c0_i32 = arith.constant 0 : i32
    %c0_i32_0 = arith.constant 0 : i32
    %c0_i32_1 = arith.constant 0 : i32
    return %c0_i32, %c0_i32_0 : i32, i32
  }
  func.func @transform_5(%arg0: i32, %arg1: i32) -> (i32, i32, i32) {
    %c0_i32 = arith.constant 0 : i32
    %c0_i32_0 = arith.constant 0 : i32
    %c0_i32_1 = arith.constant 0 : i32
    return %arg0, %c0_i32, %c0_i32_0 : i32, i32, i32
  }
}

</mosaic_0001>

<bundles_post_ra>
// kernel: tpu_custom_call.1
= control target key start
LH: loop header
LB: loop body
LE: loop exit
PB: predicated region body
PF: predicated region fallthrough
CT: control target
= control target key end

     0   :  { %10 = vsyncpa [#allocation4], 0  ;;  %s703_s0 = inlined_call_operand.hbm [shape: f32[2,4,256], index: 0, kind: input, shape index: {}]   ;;  %s704_s1 = inlined_call_operand.vmem [shape: f32[4,2], index: 1, kind: input, shape index: {}]   ;;  %s705_s2 = inlined_call_operand.vmem [shape: f32[1,2], index: 2, kind: input, shape index: {}]   ;;  %s706_s3 = inlined_call_operand.vmem [shape: f32[2,4], index: 3, kind: input, shape index: {}]   ;;  %s707_s4 = inlined_call_operand.vmem [shape: f32[1,4], index: 4, kind: input, shape index: {}]   ;;  %s708_s5 = inlined_call_operand.vmem [shape: f32[2,4,1], index: 5, kind: output, shape index: {}]  }
   0x1   :  { %12 = vsyncpa [#allocation4 + $0x1], 0  ;;  %s600_s18 = smov 0   ;;  %s602_s19 = smov 0  }
   0x2   :  { %s604_s20 = smov 0   ;;  %s606_s21 = smov 0  }
   0x3   :  { %s608_s22 = smov 0   ;;  %s610_s23 = smov 0  }
   0x4 LB: > { %s413_s24 = sadd.s32 4294967295, %s566_s23   ;;  %s30_s25 = sadd.s32 1, %s562_s22  ;;  %s566_s23 = sphi %s610_s23, %s18_s23   ;;  %s562_s22 = sphi %s608_s22, %s715_s22   ;;  %s558_s21 = sphi %s606_s21, %s714_s21   ;;  %s554_s20 = sphi %s604_s20, %s713_s20   ;;  %s550_s19 = sphi %s602_s19, %s712_s19   ;;  %s546_s18 = sphi %s600_s18, %s711_s18  }
   0x5   : > { %p32_p0 = scmp.ge.s32.totalorder %s30_s25, 2  ;;  %s39_s26 = sadd.s32 1, %s554_s20 }
   0x6   : > { %p46_p1 = scmp.ne.s32.totalorder %s554_s20, %s550_s19  ;;  %p47_p2 = scmp.eq.s32.totalorder %s566_s23, 0 }
   0x7   : > { %s717_s25 = smov (%p32_p0, %s30_s25), 0  ;;  %p52_p4 = scmp.ne.s32.totalorder %s550_s19, %s546_s18 }
   0x8   : > { %p636_p3 = por %p47_p2, %p46_p1  ;;  %s34_s28 = ssub.s32 %s562_s22, %s717_s25 }
   0x9   : > { %p53_p5 = scmp.eq.s32.totalorder %s413_s24, 0  ;;  %p37_p6 = scmp.eq.s32.totalorder %s34_s28, 0 }
   0xa   : > { %p432_p8 = scmp.lt.s32.totalorder %s566_s23, 2  ;;  %s198_s6 = sand.u32 1, %s554_s20  }
   0xb   : > { %p643_p7 = por %p53_p5, %p52_p4  ;;  %s425_s7 = sshll.u32 %s562_s22, 3 }
   0xc   : > { %s649_s30 = scalar_select %p37_p6, %s554_s20, %s39_s26  }
   0xd   : > { %s417_s8 = sshll.u32 %s198_s6, 3  ;;  %s209_s11 = scalar_lea.hbm %s703_s0, %s425_s7 }
   0xe   : > { %s211_s12 = sshll.u32 %s209_s11, 4  ;;  %s202_s13 = scalar_lea.vmem [#allocation3], %s417_s8  ;;  %s212_s12 = int_to_ptr.hbm [resolvable:$true] %s211_s12 }
   0xf   : > { %s213_s14 = sshll.u32 %s202_s13, 4  ;;  %p429_p9 = pnand %p432_p8, %p636_p3  ;;  %s214_s14 = int_to_ptr.vmem [resolvable:$true] %s213_s14 }
  0x10   : > { %p420_p10 = scmp.ge.s32.totalorder %s566_s23, 1  ;;  %p218_p11 = scmp.lt.s32.totalorder %s566_s23, 3 }
  0x11   : > { %s199_s15 = scalar_lea.sflag [#allocation4], %s198_s6 }
  0x12   : > { %431 = dma.hbm_to_vmem [thread:$0]  (!%p429_p9), %s212_s12, 128, %s214_s14, %s199_s15  }
  0x13   : > { %p219_p12 = pnand %p420_p10, %p218_p11 }
  0x14   : > { %s224_s16 = sand.u32 (!%p219_p12), 1, %s550_s19  }
  0x15   : > { %222 = sbr.rel (%p219_p12) target bundleno = 562 (0x232), region = 40  ;;  %s421_s17 = sshll.u32 (!%p219_p12), %s224_s16, 3 }
  0x16   : > { %s225_s18 = scalar_lea.sflag (!%p219_p12), [#allocation4], %s224_s16  ;;  %s228_s24 = scalar_lea.vmem (!%p219_p12), [#allocation3], %s421_s17 }
  0x1a   : > { %541 = dma.done.wait (%p643_p7), %s225_s18, 128  }
  0x1b   : > { %543 = vsyncadd (%p643_p7), %s225_s18, 4294967168  ;;  %vm264_vm0 = vcmask 3072   ;;  %v568_v0 = vmov 0.0   ;;  %v267_v1 = vld [vmem:[%s228_s24] sm:$0xff]  ;;  %vm274_vm1 = vcmask 1043456   ;;  %v569_v7 = vmov 0  }
  0x1c   : > { %265 = vst.msk [vmem:[#allocation2] sm:$0xf] %vm264_vm0, %v568_v0  ;;  %483 = vset.pattern.permute.xlu0 %v569_v7  ;;  %v307_v13 = vlaneseq  ;;  %v288_v15 = vld [vmem:[%s704_s1] sm:$0xf]  ;;  %vm295_vm2 = vcmask 11264   ;;  %vm315_vm3 = vcmask 25600  }
  0x1d   : > { %269 = vst [vmem:[#allocation1] ss:$2 sm:$0xff] %v267_v1  ;;  %v303_v24 = vld [vmem:[%s705_s2] sm:$0x1]  ;;  %p256_p13 = scmp.lt.s32.totalorder %s558_s21, 1 }
  0x1e   : > { %v308_v14 = vshrl.u32 %v307_v13, 7  ;;  %v313_v29 = vld [vmem:[%s706_s3] sm:$0x3] }
  0x1f   : > { %v323_v38 = vld [vmem:[%s707_s4] sm:$0x1]  ;;  %s719_s21 = smov (!%p256_p13, %s558_s21), 1 }
  0x20   : > { %484 = vset.pattern.permute.xlu1 %v308_v14  ;;  %s422_s10 = sshll.u32 %s719_s21, 2 }
  0x21   : > { %s259_s13 = scalar_lea.vmem %s708_s5, %s422_s10 }
  0x23   : > { %v266_v8 = vld [vmem:[#allocation2] sm:$0xf] }
  0x24   : > { %v270_v2 = vld.sshfl [vmem:[#allocation1] sm:$0xff pattern:$0x75316420]  ;;  %v271_v3 = vld.sshfl [vmem:[#allocation1 + $0x8] sm:$0xff pattern:$0x75316420] }
  0x25   : > { %v275_v4 = vsel %vm274_vm1, %v270_v2, 0.0  ;;  %v276_v5 = vsel %vm274_vm1, %v271_v3, 0.0 }
  0x26   : > { %v277_v6 = vadd.f32 %v276_v5, %v275_v4 }
  0x28   : > { %278 = vadd.xlane.f32.xlu0 %v277_v6 }
  0x9b   : > { %v279_v9 = vpop.xlane.xlu0 %278 }
  0x9c   : > { %v280_v10 = vadd.f32 %v279_v9, %v266_v8 }
  0x9e   : > { %282 = vst.msk [vmem:[#allocation2] sm:$0xf] %vm264_vm0, %v280_v10 }
  0xa5   : > { %v286_v11 = vld [vmem:[#allocation2] sm:$0xf] }
  0xa6   : > { %v287_v12 = vmul.f32 0.00390625, %v286_v11 }
  0xa8   : > { %291 = vperm.xlu0 %483, %v287_v12  }
  0xb0   : > { %485 = vset.pattern.permute.xlu0 %v308_v14 }
 0x11a   : > { %v292_v16 = vpop.permute.xlu0 %291 }
 0x11b   : > { %v294_v17 = vmul.f32 %v292_v16, %v288_v15 }
 0x11d   : > { %v296_v18 = vsel %vm295_vm2, %v294_v17, 0.0 }
 0x11e   : > { %v297_v19 = vrot.slane %v296_v18, 4 }
 0x120   : > { %v298_v20 = vadd.f32 %v297_v19, %v296_v18 }
 0x122   : > { %v299_v21 = vrot.slane %v298_v20, 2 }
 0x124   : > { %v300_v22 = vadd.f32 %v299_v21, %v298_v20 }
 0x126   : > { %v301_v23 = vrot.slane %v300_v22, 1 }
 0x128   : > { %v302_v25 = vadd.f32 %v301_v23, %v300_v22 }
 0x12a   : > { %v304_v26 = vadd.f32 %v303_v24, %v302_v25 }
 0x12c   : > { %v305_v27 = vmax.f32 %v304_v26, 0.0 }
 0x12e   : > { %v306_v28 = vperm.slane %v305_v27, 0 }
 0x130   : > { %311 = vperm.xlu1 %484, %v306_v28  }
 0x1a2   : > { %v312_v30 = vpop.permute.xlu1 %311 }
 0x1a3   : > { %v314_v31 = vmul.f32 %v313_v29, %v312_v30 }
 0x1a5   : > { %v316_v32 = vsel %vm315_vm3, %v314_v31, 0.0 }
 0x1a6   : > { %v317_v33 = vrot.slane %v316_v32, 4 }
 0x1a8   : > { %v318_v34 = vadd.f32 %v317_v33, %v316_v32 }
 0x1aa   : > { %v319_v35 = vrot.slane %v318_v34, 2 }
 0x1ac   : > { %v320_v36 = vadd.f32 %v319_v35, %v318_v34 }
 0x1ae   : > { %v321_v37 = vrot.slane %v320_v36, 1 }
 0x1b0   : > { %v322_v39 = vadd.f32 %v321_v37, %v320_v36 }
 0x1b2   : > { %v324_v40 = vadd.f32 %v323_v38, %v322_v39 }
 0x1b4   : > { %v325_v41 = vadd.f32 3.0, %v324_v40 }
 0x1b6   : > { %v326_v42 = vmax.f32 %v325_v41, 0.0 }
 0x1b8   : > { %v327_v43 = vmin.f32 %v326_v42, 6.0 }
 0x1ba   : > { %v328_v44 = vmul.f32 0.16666667, %v327_v43 }
 0x1bc   : > { %v329_v45 = vperm.slane %v328_v44, 0 }
 0x1be   : > { %334 = vperm.xlu1 %484, %v329_v45  }
 0x230   : > { %v335_v46 = vpop.permute.xlu1 %334 }
 0x231   : > { %336 = vst.msk [vmem:[%s259_s13] sm:$0xf] %vm264_vm0, %v335_v46 }
 0x232 PF: > { %s18_s23 = sadd.s32 1, %s566_s23   ;;  %s711_s18 = smov %s550_s19 }
 0x233   : > { %p15_p0 = scmp.ge.s32.totalorder %s18_s23, 4   ;;  %s712_s19 = smov %s554_s20 }
 0x234   : > { %s713_s20 = smov %s649_s30  ;;  %s714_s21 = smov %s562_s22 }
 0x235   : > { %s715_s22 = smov %s717_s25  ;;  %17 = sbr.rel (!%p15_p0) target bundleno = 4 (0x4), region = 88 }
 0x23a   :  { %356 = vsyncpa [#allocation4], 1 }
 0x23b   :  { %358 = vsyncpa [#allocation4 + $0x1], 1 }

</bundles_post_ra>
